<compile_context>
chip_gen: v6e
topology: v6e:2x2x1
jax: 0.10.0
libtpu: 0.0.40
codegen_flags: <defaults>
</compile_context>

<pallas_src>
import functools

import jax
import jax.numpy as jnp
from jax.experimental import pallas as pl
from jax.experimental.pallas import tpu as pltpu

TOP_N_FEATURES = 20
BN_EPS = 1e-5
LANE = 128


def _round_up(x, m):
    return ((x + m - 1) // m) * m


def _probe_buffered():
    """pl.Buffered(1) lets constant-index_map weights stay single-buffered."""
    if not hasattr(pl, "Buffered"):
        return False
    try:
        pl.BlockSpec((8, 128), lambda i: (0, 0), pipeline_mode=pl.Buffered(1))
        return True
    except Exception:
        return False


_HAS_BUFFERED = _probe_buffered()


# --------------------------------------------------------------------------- #
# Kernel
# --------------------------------------------------------------------------- #
def _nfm_kernel(compute_dtype,
                sae_ref, kth_ref, emb_ref, embsq_ref, wlin_ref,
                w1_ref, w2_ref, vecs_ref, out_ref):
    D_pad = w1_ref.shape[0]
    W_out = wlin_ref.shape[1]

    sae = sae_ref[...]                                   # [Bt, F]  f32
    kth = kth_ref[...]                                   # [Bt, 1]  f32

    # Coalesced vector slab rows (pack time):
    #   0: packed bias  [gbias+b_lin+b2 | b_lin | b2]  over the output lanes
    #   1: bn1 scale    2: bn1 shift    3: b1 (bn2 already folded in)
    bias_out = vecs_ref[0:1, :W_out]
    scale1 = vecs_ref[1:2, :D_pad]
    shift1 = vecs_ref[2:3, :D_pad]
    b1 = vecs_ref[3:4, :D_pad]

    # ---- linear component on FULL features, directly in packed layout ------
    lin = jnp.dot(sae.astype(compute_dtype), wlin_ref[...],
                  preferred_element_type=jnp.float32)    # [Bt, W_out]

    # ---- top-k sparsification (k-th value precomputed in the wrapper) ------
    # NOTE: keeps every value >= the k-th largest; nonzero ties at the
    # threshold are all kept (torch.topk keeps exactly k, arbitrary ties).
    sae_sp = jnp.where(sae >= kth, sae, 0.0)

    # ---- bi-interaction pooling: 0.5*((x E)^2 - x^2 E^2) -------------------
    sum_emb = jnp.dot(sae_sp.astype(compute_dtype), emb_ref[...],
                      preferred_element_type=jnp.float32)                 # [Bt, D_pad]
    sum_sq = jnp.dot((sae_sp * sae_sp).astype(compute_dtype), embsq_ref[...],
                     preferred_element_type=jnp.float32)                  # [Bt, D_pad]
    bi = 0.5 * (sum_emb * sum_emb - sum_sq)

    # ---- bi_interaction_bn (eval, folded; identity slab when batch == 1) ---
    bi = bi * scale1 + shift1

    # ---- interaction MLP (Dropouts identity; inner BN folded into w1/b1) ---
    h = jnp.maximum(
        jnp.dot(bi.astype(compute_dtype), w1_ref[...],
                preferred_element_type=jnp.float32) + b1, 0.0)
    inter = jnp.dot(h.astype(compute_dtype), w2_ref[...],
                    preferred_element_type=jnp.float32)                   # [Bt, W_out]

    # lanes [0:O] = gbias+lin+inter, [O:2O] = lin, [2O:3O] = inter.
    out_ref[...] = bias_out + lin + inter


# --------------------------------------------------------------------------- #
# One-time parameter packing (transpose / pad / fold BN / pack output lanes)
# --------------------------------------------------------------------------- #
def _fold_bn(gamma, beta, mean, var):
    scale = gamma / jnp.sqrt(var + BN_EPS)
    shift = beta - mean * scale
    return scale, shift


def pack_params(params, use_bf16=True):
    """Pack PyTorch-layout params into kernel layout (done once, not per call)."""
    F, D = params["emb"].shape
    O = params["w_lin"].shape[0]
    D_pad = _round_up(D, LANE)
    W_out = _round_up(3 * O, LANE)        # single packed output tile width
    Vmax = max(D_pad, W_out)
    wdt = jnp.bfloat16 if use_bf16 else jnp.float32

    scale1, shift1 = _fold_bn(params["bn1_gamma"], params["bn1_beta"],
                              params["bn1_mean"], params["bn1_var"])
    scale2, shift2 = _fold_bn(params["bn2_gamma"], params["bn2_beta"],
                              params["bn2_mean"], params["bn2_var"])

    def pad2(x, rows, cols):
        x = jnp.asarray(x, jnp.float32)
        return jnp.zeros((rows, cols), jnp.float32).at[:x.shape[0], :x.shape[1]].set(x)

    emb = pad2(params["emb"], F, D_pad)

    # Inner BatchNorm (bn2) folded into the first MLP layer.
    w1_f = pad2(params["w1"].T.astype(jnp.float32) * scale2[None, :], D_pad, D_pad)
    b1_f = params["b1"].astype(jnp.float32) * scale2 + shift2

    # Packed output layout: lanes [0:O]=out, [O:2O]=lin, [2O:3O]=inter.
    wlin_t = params["w_lin"].T.astype(jnp.float32)            # [F, O]
    wlin_p = jnp.zeros((F, W_out), jnp.float32)
    wlin_p = wlin_p.at[:, 0:O].set(wlin_t).at[:, O:2 * O].set(wlin_t)

    w2_t = params["w2"].T.astype(jnp.float32)                 # [D, O]
    w2_p = jnp.zeros((D_pad, W_out), jnp.float32)
    w2_p = w2_p.at[:D, 0:O].set(w2_t).at[:D, 2 * O:3 * O].set(w2_t)

    b_lin = params["b_lin"].astype(jnp.float32)
    b2 = params["b2"].astype(jnp.float32)
    gbias = params["global_bias"].astype(jnp.float32)
    bias_out = jnp.zeros((W_out,), jnp.float32)
    bias_out = (bias_out.at[0:O].set(gbias + b_lin + b2)
                        .at[O:2 * O].set(b_lin)
                        .at[2 * O:3 * O].set(b2))

    def make_vecs(s1, sh1):
        v = jnp.zeros((8, Vmax), jnp.float32)
        v = v.at[0, :W_out].set(bias_out)
        v = v.at[1, :D].set(s1)
        v = v.at[2, :D].set(sh1)
        v = v.at[3, :D].set(b1_f)
        return v

    return dict(
        F=F, D=D, O=O, D_pad=D_pad, W_out=W_out, Vmax=Vmax, compute_dtype=wdt,
        emb=emb.astype(wdt),
        emb_sq=(emb * emb).astype(wdt),                       # precomputed once
        w_lin=wlin_p.astype(wdt),
        w1=w1_f.astype(wdt),
        w2=w2_p.astype(wdt),
        vecs_bn=make_vecs(scale1, shift1),                    # batch > 1
        vecs_nobn=make_vecs(jnp.ones_like(scale1), jnp.zeros_like(shift1)),
    )


# --------------------------------------------------------------------------- #
# Generation-aware VMEM budget & batch-tile sizing
# --------------------------------------------------------------------------- #
def _vmem_budget():
    cap = 128 << 20                       # v5e / v6e physical VMEM
    try:
        cap = int(pltpu.get_tpu_info().vmem_capacity_bytes)   # 64 MiB on v7x
    except Exception:
        pass
    return (cap * 3) // 4                 # leave headroom for compiler scratch


def _weight_bytes(F, D_pad, W_out, Vmax, w_itemsize):
    mats = (F * (2 * D_pad + W_out) + D_pad * (D_pad + W_out)) * w_itemsize
    return mats + 8 * Vmax * 4


def _per_row_bytes(F, D_pad, W_out):
    stream = 2 * (F + LANE + W_out) * 4   # double-buffered sae / kth / output
    temps = (3 * F + 5 * D_pad + 3 * W_out) * 4   # live in-kernel intermediates
    return stream + temps


def _pick_batch_tile(B, F, D_pad, W_out, Vmax, w_itemsize, budget, weight_buf_factor):
    resident = weight_buf_factor * _weight_bytes(F, D_pad, W_out, Vmax, w_itemsize)
    per_row = _per_row_bytes(F, D_pad, W_out)
    avail = budget - resident
    if avail <= per_row * 8:
        # TODO(synk): very large F needs a feature-dim ("arbitrary") reduction
        # grid with a VMEM accumulator (and bf16-streamed sae); not implemented.
        bt = 8
    else:
        bt = min(avail // per_row, 4096)
    bt = int((bt // 256) * 256 if bt >= 256 else (bt // 8) * 8)
    bt = max(bt, 8)
    if B <= bt:
        return B
    if B >= 512:
        # keep >= 2 grid steps so v7x's second TensorCore has work to shard onto
        bt = min(bt, _round_up(pl.cdiv(B, 2), 256))
    return int(bt)


# --------------------------------------------------------------------------- #
# Forward wrapper
# --------------------------------------------------------------------------- #
def nfm_forward(sae, packed, top_k=TOP_N_FEATURES):
    """Returns (output, linear_out, interaction_out), each [B, output_dim]."""
    B, F = sae.shape
    assert F == packed["F"]
    D_pad, W_out, Vmax, O = packed["D_pad"], packed["W_out"], packed["Vmax"], packed["O"]
    cdt = packed["compute_dtype"]
    w_itemsize = jnp.dtype(cdt).itemsize
    sae = sae.astype(jnp.float32)

    # top-k threshold computed OUTSIDE the kernel (no serial in-kernel XLU chain)
    if top_k is not None and top_k < F:
        kth = jax.lax.top_k(sae, top_k)[0][:, top_k - 1:top_k]   # [B, 1]
    else:
        kth = jnp.full((B, 1), -jnp.inf, jnp.float32)

    # bi_interaction_bn only applies when batch > 1 (static Python B, as in torch).
    vecs = packed["vecs_bn"] if B > 1 else packed["vecs_nobn"]

    budget = _vmem_budget()
    Bt = _pick_batch_tile(B, F, D_pad, W_out, Vmax, w_itemsize, budget,
                          weight_buf_factor=1 if _HAS_BUFFERED else 2)

    # Pad batch to a multiple of Bt so the last grid step never reads OOB rows.
    B_pad = _round_up(B, Bt)
    if B_pad != B:
        sae = jnp.pad(sae, ((0, B_pad - B), (0, 0)))
        kth = jnp.pad(kth, ((0, B_pad - B), (0, 0)))
    grid = (B_pad // Bt,)

    wbytes = _weight_bytes(F, D_pad, W_out, Vmax, w_itemsize)
    per_row = _per_row_bytes(F, D_pad, W_out)
    flops = 2 * B_pad * (F * (W_out + 2 * D_pad) + D_pad * (D_pad + W_out))
    bytes_accessed = B_pad * (F + 1 + W_out) * 4 + wbytes

    def call(single_buffer_weights):
        if single_buffer_weights:
            def const_spec(shape):
                return pl.BlockSpec(shape, lambda i: (0, 0),
                                    pipeline_mode=pl.Buffered(1))
            wfac = 1
        else:
            def const_spec(shape):
                return pl.BlockSpec(shape, lambda i: (0, 0))
            wfac = 2
        vmem_need = wfac * wbytes + Bt * per_row
        vmem_limit = int(min(max(int(vmem_need * 1.25) + (4 << 20), 16 << 20), budget))
        return pl.pallas_call(
            functools.partial(_nfm_kernel, cdt),
            grid=grid,
            out_shape=jax.ShapeDtypeStruct((B_pad, W_out), jnp.float32),
            in_specs=[
                pl.BlockSpec((Bt, F), lambda i: (i, 0)),       # sae (streamed)
                pl.BlockSpec((Bt, 1), lambda i: (i, 0)),       # k-th threshold
                const_spec((F, D_pad)),                        # emb
                const_spec((F, D_pad)),                        # emb^2
                const_spec((F, W_out)),                        # w_lin (packed cols)
                const_spec((D_pad, D_pad)),                    # w1 (bn2 folded)
                const_spec((D_pad, W_out)),                    # w2 (packed cols)
                const_spec((8, Vmax)),                         # coalesced vectors
            ],
            out_specs=pl.BlockSpec((Bt, W_out), lambda i: (i, 0)),
            compiler_params=pltpu.CompilerParams(
                dimension_semantics=("parallel",),
                vmem_limit_bytes=vmem_limit),
            cost_estimate=pl.CostEstimate(flops=flops, transcendentals=0,
                                          bytes_accessed=bytes_accessed),
        )(sae, kth, packed["emb"], packed["emb_sq"], packed["w_lin"],
          packed["w1"], packed["w2"], vecs)

    if _HAS_BUFFERED:
        try:
            slab = call(True)
        except Exception:
            slab = call(False)            # fall back to default double-buffering
    else:
        slab = call(False)

    # Packed lanes: [0:O]=out, [O:2O]=lin, [2O:3O]=inter (tiny slices now).
    out = slab[:B, :O]
    lin = slab[:B, O:2 * O]
    inter = slab[:B, 2 * O:3 * O]
    return out, lin, inter


# --------------------------------------------------------------------------- #
# Pure-JAX reference (mirrors the PyTorch forward, eval mode)
# --------------------------------------------------------------------------- #
def nfm_reference(sae, params, top_k=TOP_N_FEATURES):
    B, F = sae.shape
    lin = sae @ params["w_lin"].T + params["b_lin"]
    x = sae
    if top_k is not None and top_k < F:
        vals, idx = jax.lax.top_k(x, top_k)
        x = jax.vmap(lambda i, v: jnp.zeros((F,), sae.dtype).at[i].set(v))(idx, vals)
    emb = params["emb"]
    se = x @ emb
    sq = (x * x) @ (emb * emb)
    bi = 0.5 * (se * se - sq)
    if B > 1:
        bi = ((bi - params["bn1_mean"]) / jnp.sqrt(params["bn1_var"] + BN_EPS)
              * params["bn1_gamma"] + params["bn1_beta"])
    h = bi @ params["w1"].T + params["b1"]
    h = ((h - params["bn2_mean"]) / jnp.sqrt(params["bn2_var"] + BN_EPS)
         * params["bn2_gamma"] + params["bn2_beta"])
    h = jnp.maximum(h, 0.0)
    inter = h @ params["w2"].T + params["b2"]
    out = params["global_bias"] + lin + inter
    return out, lin, inter


def init_params(key, num_sae_features, embedding_dim, output_dim):
    F, D, O = num_sae_features, embedding_dim, output_dim
    k = jax.random.split(key, 4)
    xb_emb = (6.0 / (F + D)) ** 0.5     # xavier_uniform
    xb_lin = (6.0 / (O + F)) ** 0.5     # xavier_uniform
    kb = (6.0 / D) ** 0.5               # kaiming_uniform, fan_in, relu
    return dict(
        emb=jax.random.uniform(k[0], (F, D), jnp.float32, -xb_emb, xb_emb),
        w_lin=jax.random.uniform(k[1], (O, F), jnp.float32, -xb_lin, xb_lin),
        b_lin=jnp.zeros((O,), jnp.float32),
        global_bias=jnp.zeros((O,), jnp.float32),
        w1=jax.random.uniform(k[2], (D, D), jnp.float32, -kb, kb),
        b1=jnp.zeros((D,), jnp.float32),
        w2=jax.random.uniform(k[3], (O, D), jnp.float32, -kb, kb),
        b2=jnp.zeros((O,), jnp.float32),
        bn1_gamma=jnp.ones((D,), jnp.float32), bn1_beta=jnp.zeros((D,), jnp.float32),
        bn1_mean=jnp.zeros((D,), jnp.float32), bn1_var=jnp.ones((D,), jnp.float32),
        bn2_gamma=jnp.ones((D,), jnp.float32), bn2_beta=jnp.zeros((D,), jnp.float32),
        bn2_mean=jnp.zeros((D,), jnp.float32), bn2_var=jnp.ones((D,), jnp.float32),
    )


if __name__ == "__main__":
    B, F, D, O = 8, 64, 32, 16          # batch, num_sae_features, embedding_dim, output_dim
    key = jax.random.PRNGKey(0)
    kx, kp = jax.random.split(key)
    # SAE features are non-negative activations; |N(0,1)| gives distinct values.
    sae = jnp.abs(jax.random.normal(kx, (B, F), jnp.float32))
    params = init_params(kp, F, D, O)

    ref_out, ref_lin, ref_inter = nfm_reference(sae, params)

    # Exact (all-f32) kernel path -------------------------------------------
    packed_f32 = pack_params(params, use_bf16=False)
    out, lin, inter = jax.block_until_ready(nfm_forward(sae, packed_f32))
    assert jnp.allclose(out, ref_out, atol=1e-4, rtol=1e-4)
    assert jnp.allclose(lin, ref_lin, atol=1e-4, rtol=1e-4)
    assert jnp.allclose(inter, ref_inter, atol=1e-4, rtol=1e-4)

    # bf16-on-MXU path (f32 accumulation / elementwise) — looser tolerance ---
    packed_bf16 = pack_params(params, use_bf16=True)
    out_b, lin_b, inter_b = jax.block_until_ready(nfm_forward(sae, packed_bf16))
    assert jnp.allclose(out_b, ref_out, atol=2e-1, rtol=5e-2)
    assert jnp.allclose(lin_b, ref_lin, atol=2e-1, rtol=5e-2)
    assert jnp.allclose(inter_b, ref_inter, atol=2e-1, rtol=5e-2)

    # TODO(synk): torch.isnan/isinf fallback guards and check_tensor debug prints
    # are host-side diagnostics with no kernel equivalent; omitted.
    print("KERNEL_OK")
</pallas_src>

<mosaic_0001>
module attributes {stable_mosaic.version = 11 : i64} {
  func.func @_nfm_kernel(%arg0: i32, %arg1: memref<8x64xf32, #tpu.memory_space<vmem>>, %arg2: memref<8x1xf32, #tpu.memory_space<vmem>>, %arg3: memref<64x128xf32, #tpu.memory_space<vmem>>, %arg4: memref<64x128xf32, #tpu.memory_space<vmem>>, %arg5: memref<64x128xf32, #tpu.memory_space<vmem>>, %arg6: memref<128x128xf32, #tpu.memory_space<vmem>>, %arg7: memref<128x128xf32, #tpu.memory_space<vmem>>, %arg8: memref<8x128xf32, #tpu.memory_space<vmem>>, %arg9: memref<8x128xf32, #tpu.memory_space<vmem>>) attributes {dimension_semantics = [#tpu.dimension_semantics<parallel>], iteration_bounds = array<i64: 1>, scalar_prefetch = 0 : i64, scratch_operands = 0 : i64, tpu.core_type = #tpu.core_type<tc>, window_params = [{transform_indices = @transform_0, window_bounds = array<i64: 8, 64>}, {transform_indices = @transform_1, window_bounds = array<i64: 8, 1>}, {pipeline_mode = #tpu.pipeline_mode<synchronous>, transform_indices = @transform_2, window_bounds = array<i64: 64, 128>}, {pipeline_mode = #tpu.pipeline_mode<synchronous>, transform_indices = @transform_3, window_bounds = array<i64: 64, 128>}, {pipeline_mode = #tpu.pipeline_mode<synchronous>, transform_indices = @transform_4, window_bounds = array<i64: 64, 128>}, {pipeline_mode = #tpu.pipeline_mode<synchronous>, transform_indices = @transform_5, window_bounds = array<i64: 128, 128>}, {pipeline_mode = #tpu.pipeline_mode<synchronous>, transform_indices = @transform_6, window_bounds = array<i64: 128, 128>}, {pipeline_mode = #tpu.pipeline_mode<synchronous>, transform_indices = @transform_7, window_bounds = array<i64: 8, 128>}, {transform_indices = @transform_8, window_bounds = array<i64: 8, 128>}]} {
    %c0 = arith.constant 0 : index
    %c0_0 = arith.constant 0 : index
    %0 = vector.load %arg1[%c0, %c0_0] : memref<8x64xf32, #tpu.memory_space<vmem>>, vector<8x64xf32>
    %c0_1 = arith.constant 0 : index
    %c0_2 = arith.constant 0 : index
    %1 = vector.load %arg2[%c0_1, %c0_2] : memref<8x1xf32, #tpu.memory_space<vmem>>, vector<8x1xf32>
    %c0_3 = arith.constant 0 : index
    %c0_4 = arith.constant 0 : index
    %2 = vector.load %arg8[%c0_3, %c0_4] : memref<8x128xf32, #tpu.memory_space<vmem>>, vector<1x128xf32>
    %c1 = arith.constant 1 : index
    %c0_5 = arith.constant 0 : index
    %3 = vector.load %arg8[%c1, %c0_5] : memref<8x128xf32, #tpu.memory_space<vmem>>, vector<1x128xf32>
    %c2 = arith.constant 2 : index
    %c0_6 = arith.constant 0 : index
    %4 = vector.load %arg8[%c2, %c0_6] : memref<8x128xf32, #tpu.memory_space<vmem>>, vector<1x128xf32>
    %c3 = arith.constant 3 : index
    %c0_7 = arith.constant 0 : index
    %5 = vector.load %arg8[%c3, %c0_7] : memref<8x128xf32, #tpu.memory_space<vmem>>, vector<1x128xf32>
    %c0_8 = arith.constant 0 : index
    %c0_9 = arith.constant 0 : index
    %6 = vector.load %arg5[%c0_8, %c0_9] : memref<64x128xf32, #tpu.memory_space<vmem>>, vector<64x128xf32>
    %cst = arith.constant dense<0.000000e+00> : vector<8x128xf32>
    %7 = tpu.matmul %0, %6, %cst {dimension_numbers = #tpu.dot_dimension_numbers<[1], [0], [0], [1], [0, 0, 1, 1], [], []>} : vector<8x64xf32>, vector<64x128xf32>, vector<8x128xf32> -> vector<8x128xf32>
    %8 = vector.broadcast %1 : vector<8x1xf32> to vector<8x64xf32>
    %9 = arith.cmpf oge, %0, %8 : vector<8x64xf32>
    %cst_10 = arith.constant 0.000000e+00 : f32
    %10 = vector.broadcast %cst_10 : f32 to vector<8x64xf32>
    %11 = arith.select %9, %0, %10 : vector<8x64xi1>, vector<8x64xf32>
    %c0_11 = arith.constant 0 : index
    %c0_12 = arith.constant 0 : index
    %12 = vector.load %arg3[%c0_11, %c0_12] : memref<64x128xf32, #tpu.memory_space<vmem>>, vector<64x128xf32>
    %cst_13 = arith.constant dense<0.000000e+00> : vector<8x128xf32>
    %13 = tpu.matmul %11, %12, %cst_13 {dimension_numbers = #tpu.dot_dimension_numbers<[1], [0], [0], [1], [0, 0, 1, 1], [], []>} : vector<8x64xf32>, vector<64x128xf32>, vector<8x128xf32> -> vector<8x128xf32>
    %14 = arith.mulf %11, %11 : vector<8x64xf32>
    %c0_14 = arith.constant 0 : index
    %c0_15 = arith.constant 0 : index
    %15 = vector.load %arg4[%c0_14, %c0_15] : memref<64x128xf32, #tpu.memory_space<vmem>>, vector<64x128xf32>
    %cst_16 = arith.constant dense<0.000000e+00> : vector<8x128xf32>
    %16 = tpu.matmul %14, %15, %cst_16 {dimension_numbers = #tpu.dot_dimension_numbers<[1], [0], [0], [1], [0, 0, 1, 1], [], []>} : vector<8x64xf32>, vector<64x128xf32>, vector<8x128xf32> -> vector<8x128xf32>
    %17 = arith.mulf %13, %13 : vector<8x128xf32>
    %18 = arith.subf %17, %16 : vector<8x128xf32>
    %cst_17 = arith.constant 5.000000e-01 : f32
    %19 = vector.broadcast %cst_17 : f32 to vector<8x128xf32>
    %20 = arith.mulf %19, %18 : vector<8x128xf32>
    %21 = vector.broadcast %3 : vector<1x128xf32> to vector<8x128xf32>
    %22 = arith.mulf %20, %21 : vector<8x128xf32>
    %23 = vector.broadcast %4 : vector<1x128xf32> to vector<8x128xf32>
    %24 = arith.addf %22, %23 : vector<8x128xf32>
    %c0_18 = arith.constant 0 : index
    %c0_19 = arith.constant 0 : index
    %25 = vector.load %arg6[%c0_18, %c0_19] : memref<128x128xf32, #tpu.memory_space<vmem>>, vector<128x128xf32>
    %cst_20 = arith.constant dense<0.000000e+00> : vector<8x128xf32>
    %26 = tpu.matmul %24, %25, %cst_20 {dimension_numbers = #tpu.dot_dimension_numbers<[1], [0], [0], [1], [0, 0, 1, 1], [], []>} : vector<8x128xf32>, vector<128x128xf32>, vector<8x128xf32> -> vector<8x128xf32>
    %27 = vector.broadcast %5 : vector<1x128xf32> to vector<8x128xf32>
    %28 = arith.addf %26, %27 : vector<8x128xf32>
    %cst_21 = arith.constant 0.000000e+00 : f32
    %29 = vector.broadcast %cst_21 : f32 to vector<8x128xf32>
    %30 = arith.maximumf %28, %29 : vector<8x128xf32>
    %c0_22 = arith.constant 0 : index
    %c0_23 = arith.constant 0 : index
    %31 = vector.load %arg7[%c0_22, %c0_23] : memref<128x128xf32, #tpu.memory_space<vmem>>, vector<128x128xf32>
    %cst_24 = arith.constant dense<0.000000e+00> : vector<8x128xf32>
    %32 = tpu.matmul %30, %31, %cst_24 {dimension_numbers = #tpu.dot_dimension_numbers<[1], [0], [0], [1], [0, 0, 1, 1], [], []>} : vector<8x128xf32>, vector<128x128xf32>, vector<8x128xf32> -> vector<8x128xf32>
    %33 = vector.broadcast %2 : vector<1x128xf32> to vector<8x128xf32>
    %34 = arith.addf %33, %7 : vector<8x128xf32>
    %35 = arith.addf %34, %32 : vector<8x128xf32>
    %c0_25 = arith.constant 0 : index
    %c0_26 = arith.constant 0 : index
    %36 = vector.load %arg9[%c0_25, %c0_26] : memref<8x128xf32, #tpu.memory_space<vmem>>, vector<8x128xf32>
    tpu.vector_store %arg9[%c0_25, %c0_26], %35 {strides = array<i32>} : memref<8x128xf32, #tpu.memory_space<vmem>>, vector<8x128xf32>,
    return
  }
  func.func @transform_0(%arg0: i32) -> (i32, i32) {
    %c0_i32 = arith.constant 0 : i32
    %c0_i32_0 = arith.constant 0 : i32
    return %arg0, %c0_i32 : i32, i32
  }
  func.func @transform_1(%arg0: i32) -> (i32, i32) {
    %c0_i32 = arith.constant 0 : i32
    %c0_i32_0 = arith.constant 0 : i32
    return %arg0, %c0_i32 : i32, i32
  }
  func.func @transform_2(%arg0: i32) -> (i32, i32) {
    %c0_i32 = arith.constant 0 : i32
    %c0_i32_0 = arith.constant 0 : i32
    %c0_i32_1 = arith.constant 0 : i32
    return %c0_i32, %c0_i32_0 : i32, i32
  }
  func.func @transform_3(%arg0: i32) -> (i32, i32) {
    %c0_i32 = arith.constant 0 : i32
    %c0_i32_0 = arith.constant 0 : i32
    %c0_i32_1 = arith.constant 0 : i32
    return %c0_i32, %c0_i32_0 : i32, i32
  }
  func.func @transform_4(%arg0: i32) -> (i32, i32) {
    %c0_i32 = arith.constant 0 : i32
    %c0_i32_0 = arith.constant 0 : i32
    %c0_i32_1 = arith.constant 0 : i32
    return %c0_i32, %c0_i32_0 : i32, i32
  }
  func.func @transform_5(%arg0: i32) -> (i32, i32) {
    %c0_i32 = arith.constant 0 : i32
    %c0_i32_0 = arith.constant 0 : i32
    %c0_i32_1 = arith.constant 0 : i32
    return %c0_i32, %c0_i32_0 : i32, i32
  }
  func.func @transform_6(%arg0: i32) -> (i32, i32) {
    %c0_i32 = arith.constant 0 : i32
    %c0_i32_0 = arith.constant 0 : i32
    %c0_i32_1 = arith.constant 0 : i32
    return %c0_i32, %c0_i32_0 : i32, i32
  }
  func.func @transform_7(%arg0: i32) -> (i32, i32) {
    %c0_i32 = arith.constant 0 : i32
    %c0_i32_0 = arith.constant 0 : i32
    %c0_i32_1 = arith.constant 0 : i32
    return %c0_i32, %c0_i32_0 : i32, i32
  }
  func.func @transform_8(%arg0: i32) -> (i32, i32) {
    %c0_i32 = arith.constant 0 : i32
    %c0_i32_0 = arith.constant 0 : i32
    return %arg0, %c0_i32 : i32, i32
  }
}

module attributes {stable_mosaic.version = 11 : i64} {
  func.func @_nfm_kernel(%arg0: i32, %arg1: memref<8x64xf32, #tpu.memory_space<vmem>>, %arg2: memref<8x1xf32, #tpu.memory_space<vmem>>, %arg3: memref<64x128xf32, #tpu.memory_space<vmem>>, %arg4: memref<64x128xf32, #tpu.memory_space<vmem>>, %arg5: memref<64x128xf32, #tpu.memory_space<vmem>>, %arg6: memref<128x128xf32, #tpu.memory_space<vmem>>, %arg7: memref<128x128xf32, #tpu.memory_space<vmem>>, %arg8: memref<8x128xf32, #tpu.memory_space<vmem>>, %arg9: memref<8x128xf32, #tpu.memory_space<vmem>>) attributes {dimension_semantics = [#tpu.dimension_semantics<parallel>], iteration_bounds = array<i64: 1>, scalar_prefetch = 0 : i64, scratch_operands = 0 : i64, tpu.core_type = #tpu.core_type<tc>, window_params = [{transform_indices = @transform_0, window_bounds = array<i64: 8, 64>}, {transform_indices = @transform_1, window_bounds = array<i64: 8, 1>}, {pipeline_mode = #tpu.pipeline_mode<synchronous>, transform_indices = @transform_2, window_bounds = array<i64: 64, 128>}, {pipeline_mode = #tpu.pipeline_mode<synchronous>, transform_indices = @transform_3, window_bounds = array<i64: 64, 128>}, {pipeline_mode = #tpu.pipeline_mode<synchronous>, transform_indices = @transform_4, window_bounds = array<i64: 64, 128>}, {pipeline_mode = #tpu.pipeline_mode<synchronous>, transform_indices = @transform_5, window_bounds = array<i64: 128, 128>}, {pipeline_mode = #tpu.pipeline_mode<synchronous>, transform_indices = @transform_6, window_bounds = array<i64: 128, 128>}, {pipeline_mode = #tpu.pipeline_mode<synchronous>, transform_indices = @transform_7, window_bounds = array<i64: 8, 128>}, {transform_indices = @transform_8, window_bounds = array<i64: 8, 128>}]} {
    %c0 = arith.constant 0 : index
    %c0_0 = arith.constant 0 : index
    %0 = vector.load %arg1[%c0, %c0_0] : memref<8x64xf32, #tpu.memory_space<vmem>>, vector<8x64xf32>
    %c0_1 = arith.constant 0 : index
    %c0_2 = arith.constant 0 : index
    %1 = vector.load %arg2[%c0_1, %c0_2] : memref<8x1xf32, #tpu.memory_space<vmem>>, vector<8x1xf32>
    %c0_3 = arith.constant 0 : index
    %c0_4 = arith.constant 0 : index
    %2 = vector.load %arg8[%c0_3, %c0_4] : memref<8x128xf32, #tpu.memory_space<vmem>>, vector<1x128xf32>
    %c1 = arith.constant 1 : index
    %c0_5 = arith.constant 0 : index
    %3 = vector.load %arg8[%c1, %c0_5] : memref<8x128xf32, #tpu.memory_space<vmem>>, vector<1x128xf32>
    %c2 = arith.constant 2 : index
    %c0_6 = arith.constant 0 : index
    %4 = vector.load %arg8[%c2, %c0_6] : memref<8x128xf32, #tpu.memory_space<vmem>>, vector<1x128xf32>
    %c3 = arith.constant 3 : index
    %c0_7 = arith.constant 0 : index
    %5 = vector.load %arg8[%c3, %c0_7] : memref<8x128xf32, #tpu.memory_space<vmem>>, vector<1x128xf32>
    %c0_8 = arith.constant 0 : index
    %c0_9 = arith.constant 0 : index
    %6 = vector.load %arg5[%c0_8, %c0_9] : memref<64x128xf32, #tpu.memory_space<vmem>>, vector<64x128xf32>
    %cst = arith.constant dense<0.000000e+00> : vector<8x128xf32>
    %7 = tpu.matmul %0, %6, %cst {dimension_numbers = #tpu.dot_dimension_numbers<[1], [0], [0], [1], [0, 0, 1, 1], [], []>} : vector<8x64xf32>, vector<64x128xf32>, vector<8x128xf32> -> vector<8x128xf32>
    %8 = vector.broadcast %1 : vector<8x1xf32> to vector<8x64xf32>
    %9 = arith.cmpf oge, %0, %8 : vector<8x64xf32>
    %cst_10 = arith.constant 0.000000e+00 : f32
    %10 = vector.broadcast %cst_10 : f32 to vector<8x64xf32>
    %11 = arith.select %9, %0, %10 : vector<8x64xi1>, vector<8x64xf32>
    %c0_11 = arith.constant 0 : index
    %c0_12 = arith.constant 0 : index
    %12 = vector.load %arg3[%c0_11, %c0_12] : memref<64x128xf32, #tpu.memory_space<vmem>>, vector<64x128xf32>
    %cst_13 = arith.constant dense<0.000000e+00> : vector<8x128xf32>
    %13 = tpu.matmul %11, %12, %cst_13 {dimension_numbers = #tpu.dot_dimension_numbers<[1], [0], [0], [1], [0, 0, 1, 1], [], []>} : vector<8x64xf32>, vector<64x128xf32>, vector<8x128xf32> -> vector<8x128xf32>
    %14 = arith.mulf %11, %11 : vector<8x64xf32>
    %c0_14 = arith.constant 0 : index
    %c0_15 = arith.constant 0 : index
    %15 = vector.load %arg4[%c0_14, %c0_15] : memref<64x128xf32, #tpu.memory_space<vmem>>, vector<64x128xf32>
    %cst_16 = arith.constant dense<0.000000e+00> : vector<8x128xf32>
    %16 = tpu.matmul %14, %15, %cst_16 {dimension_numbers = #tpu.dot_dimension_numbers<[1], [0], [0], [1], [0, 0, 1, 1], [], []>} : vector<8x64xf32>, vector<64x128xf32>, vector<8x128xf32> -> vector<8x128xf32>
    %17 = arith.mulf %13, %13 : vector<8x128xf32>
    %18 = arith.subf %17, %16 : vector<8x128xf32>
    %cst_17 = arith.constant 5.000000e-01 : f32
    %19 = vector.broadcast %cst_17 : f32 to vector<8x128xf32>
    %20 = arith.mulf %19, %18 : vector<8x128xf32>
    %21 = vector.broadcast %3 : vector<1x128xf32> to vector<8x128xf32>
    %22 = arith.mulf %20, %21 : vector<8x128xf32>
    %23 = vector.broadcast %4 : vector<1x128xf32> to vector<8x128xf32>
    %24 = arith.addf %22, %23 : vector<8x128xf32>
    %c0_18 = arith.constant 0 : index
    %c0_19 = arith.constant 0 : index
    %25 = vector.load %arg6[%c0_18, %c0_19] : memref<128x128xf32, #tpu.memory_space<vmem>>, vector<128x128xf32>
    %cst_20 = arith.constant dense<0.000000e+00> : vector<8x128xf32>
    %26 = tpu.matmul %24, %25, %cst_20 {dimension_numbers = #tpu.dot_dimension_numbers<[1], [0], [0], [1], [0, 0, 1, 1], [], []>} : vector<8x128xf32>, vector<128x128xf32>, vector<8x128xf32> -> vector<8x128xf32>
    %27 = vector.broadcast %5 : vector<1x128xf32> to vector<8x128xf32>
    %28 = arith.addf %26, %27 : vector<8x128xf32>
    %cst_21 = arith.constant 0.000000e+00 : f32
    %29 = vector.broadcast %cst_21 : f32 to vector<8x128xf32>
    %30 = arith.maximumf %28, %29 : vector<8x128xf32>
    %c0_22 = arith.constant 0 : index
    %c0_23 = arith.constant 0 : index
    %31 = vector.load %arg7[%c0_22, %c0_23] : memref<128x128xf32, #tpu.memory_space<vmem>>, vector<128x128xf32>
    %cst_24 = arith.constant dense<0.000000e+00> : vector<8x128xf32>
    %32 = tpu.matmul %30, %31, %cst_24 {dimension_numbers = #tpu.dot_dimension_numbers<[1], [0], [0], [1], [0, 0, 1, 1], [], []>} : vector<8x128xf32>, vector<128x128xf32>, vector<8x128xf32> -> vector<8x128xf32>
    %33 = vector.broadcast %2 : vector<1x128xf32> to vector<8x128xf32>
    %34 = arith.addf %33, %7 : vector<8x128xf32>
    %35 = arith.addf %34, %32 : vector<8x128xf32>
    %c0_25 = arith.constant 0 : index
    %c0_26 = arith.constant 0 : index
    %36 = vector.load %arg9[%c0_25, %c0_26] : memref<8x128xf32, #tpu.memory_space<vmem>>, vector<8x128xf32>
    tpu.vector_store %arg9[%c0_25, %c0_26], %35 {strides = array<i32>} : memref<8x128xf32, #tpu.memory_space<vmem>>, vector<8x128xf32>,
    return
  }
  func.func @transform_0(%arg0: i32) -> (i32, i32) {
    %c0_i32 = arith.constant 0 : i32
    %c0_i32_0 = arith.constant 0 : i32
    return %arg0, %c0_i32 : i32, i32
  }
  func.func @transform_1(%arg0: i32) -> (i32, i32) {
    %c0_i32 = arith.constant 0 : i32
    %c0_i32_0 = arith.constant 0 : i32
    return %arg0, %c0_i32 : i32, i32
  }
  func.func @transform_2(%arg0: i32) -> (i32, i32) {
    %c0_i32 = arith.constant 0 : i32
    %c0_i32_0 = arith.constant 0 : i32
    %c0_i32_1 = arith.constant 0 : i32
    return %c0_i32, %c0_i32_0 : i32, i32
  }
  func.func @transform_3(%arg0: i32) -> (i32, i32) {
    %c0_i32 = arith.constant 0 : i32
    %c0_i32_0 = arith.constant 0 : i32
    %c0_i32_1 = arith.constant 0 : i32
    return %c0_i32, %c0_i32_0 : i32, i32
  }
  func.func @transform_4(%arg0: i32) -> (i32, i32) {
    %c0_i32 = arith.constant 0 : i32
    %c0_i32_0 = arith.constant 0 : i32
    %c0_i32_1 = arith.constant 0 : i32
    return %c0_i32, %c0_i32_0 : i32, i32
  }
  func.func @transform_5(%arg0: i32) -> (i32, i32) {
    %c0_i32 = arith.constant 0 : i32
    %c0_i32_0 = arith.constant 0 : i32
    %c0_i32_1 = arith.constant 0 : i32
    return %c0_i32, %c0_i32_0 : i32, i32
  }
  func.func @transform_6(%arg0: i32) -> (i32, i32) {
    %c0_i32 = arith.constant 0 : i32
    %c0_i32_0 = arith.constant 0 : i32
    %c0_i32_1 = arith.constant 0 : i32
    return %c0_i32, %c0_i32_0 : i32, i32
  }
  func.func @transform_7(%arg0: i32) -> (i32, i32) {
    %c0_i32 = arith.constant 0 : i32
    %c0_i32_0 = arith.constant 0 : i32
    %c0_i32_1 = arith.constant 0 : i32
    return %c0_i32, %c0_i32_0 : i32, i32
  }
  func.func @transform_8(%arg0: i32) -> (i32, i32) {
    %c0_i32 = arith.constant 0 : i32
    %c0_i32_0 = arith.constant 0 : i32
    return %arg0, %c0_i32 : i32, i32
  }
}

</mosaic_0001>

<bundles_post_ra>
// kernel: tpu_custom_call.1
= control target key start
LH: loop header
LB: loop body
LE: loop exit
PB: predicated region body
PF: predicated region fallthrough
CT: control target
= control target key end

     0   :  { %13 = vsyncpa [#allocation3], 0  ;;  %s1081_s0 = inlined_call_operand.vmem [shape: f32[8,64], index: 0, kind: input, shape index: {}]   ;;  %s1082_s1 = inlined_call_operand.vmem [shape: f32[8,1], index: 1, kind: input, shape index: {}]   ;;  %s1083_s2 = inlined_call_operand.hbm [shape: f32[64,128], index: 2, kind: input, shape index: {}]   ;;  %s1084_s3 = inlined_call_operand.hbm [shape: f32[64,128], index: 3, kind: input, shape index: {}]   ;;  %s1085_s4 = inlined_call_operand.hbm [shape: f32[64,128], index: 4, kind: input, shape index: {}]   ;;  %s1086_s5 = inlined_call_operand.hbm [shape: f32[128,128], index: 5, kind: input, shape index: {}]   ;;  %s1087_s6 = inlined_call_operand.hbm [shape: f32[128,128], index: 6, kind: input, shape index: {}]   ;;  %s1088_s7 = inlined_call_operand.vmem [shape: f32[8,128], index: 7, kind: input, shape index: {}]   ;;  %s1089_s8 = inlined_call_operand.hbm [shape: f32[8,128], index: 8, kind: output, shape index: {}]  }
   0x1   :  { %14 = vsyncpa [#allocation6], 0 }
   0x2   :  { %15 = vsyncpa [#allocation9], 0 }
   0x3   :  { %16 = vsyncpa [#allocation4], 0  ;;  %s905_s27 = smov [#allocation5]   ;;  %s906_s29 = smov [#allocation8]  }
   0x4   :  { %s38_s28 = sshll.u32 %s905_s27, 4  ;;  %s62_s30 = sshll.u32 %s906_s29, 4  ;;  %s39_s28 = int_to_ptr.vmem [resolvable:$true] %s38_s28  ;;  %s63_s30 = int_to_ptr.vmem [resolvable:$true] %s62_s30 }
   0x5   :  { %s785_s9 = scalar_lea.vmem %s39_s28, 1024  ;;  %p790_p1 = scmp.lt.s32.totalorder %s39_s28, %s39_s28 }
   0x6   :  { %p786_p0 = scmp.ne.s32.totalorder %s39_s28, %s785_s9  ;;  %p791_p2 = scmp.lt.s32.totalorder %s785_s9, %s785_s9 }
   0x8   :  { %p792_p3 = por %p791_p2, %p790_p1 }
   0xa   :  { %p793_p4 = pnand %p792_p3, %p786_p0 }
   0xc   :  { %796 = shalt.err (!%p793_p4)
}
   0xd   :  { %s907_s10 = smov 128   ;;  %s908_s11 = smov 8  }
   0xe   :  { %44 = dma.hbm_to_vmem [thread:$0]  %s1084_s3, 1024, %s39_s28, [#allocation6], %s907_s10, %s907_s10, %s908_s11  }
   0xf   :  { %s805_s14 = scalar_lea.vmem %s63_s30, 2048  ;;  %p810_p6 = scmp.lt.s32.totalorder %s63_s30, %s63_s30 }
  0x10   :  { %p806_p5 = scmp.ne.s32.totalorder %s63_s30, %s805_s14  ;;  %p811_p7 = scmp.lt.s32.totalorder %s805_s14, %s805_s14 }
  0x12   :  { %p812_p8 = por %p811_p7, %p810_p6 }
  0x14   :  { %p813_p9 = pnand %p812_p8, %p806_p5 }
  0x16   :  { %816 = shalt.err (!%p813_p9)
}
  0x17   :  { %68 = dma.hbm_to_vmem [thread:$0]  %s1086_s5, 2048, %s63_s30, [#allocation9], %s907_s10, %s907_s10, %s908_s11  }
  0x18   :  { %s909_s17 = smov [#allocation2]   ;;  %s910_s19 = smov [#allocation7]  }
  0x19   :  { %s26_s18 = sshll.u32 %s909_s17, 4  ;;  %s50_s20 = sshll.u32 %s910_s19, 4  ;;  %s27_s18 = int_to_ptr.vmem [resolvable:$true] %s26_s18  ;;  %s51_s20 = int_to_ptr.vmem [resolvable:$true] %s50_s20 }
  0x1a   :  { %s825_s3 = scalar_lea.vmem %s27_s18, 1024  ;;  %p830_p11 = scmp.lt.s32.totalorder %s27_s18, %s27_s18 }
  0x1b   :  { %p826_p10 = scmp.ne.s32.totalorder %s27_s18, %s825_s3  ;;  %p831_p12 = scmp.lt.s32.totalorder %s825_s3, %s825_s3 }
  0x1d   :  { %p832_p13 = por %p831_p12, %p830_p11 }
  0x1f   :  { %p833_p0 = pnand %p832_p13, %p826_p10 }
  0x21   :  { %836 = shalt.err (!%p833_p0)
}
  0x22   :  { %32 = dma.hbm_to_vmem [thread:$0]  %s1083_s2, 1024, %s27_s18, [#allocation3], %s907_s10, %s907_s10, %s908_s11  }
  0x23   :  { %s845_s5 = scalar_lea.vmem %s51_s20, 1024  ;;  %p850_p2 = scmp.lt.s32.totalorder %s51_s20, %s51_s20 }
  0x24   :  { %p846_p1 = scmp.ne.s32.totalorder %s51_s20, %s845_s5  ;;  %p851_p3 = scmp.lt.s32.totalorder %s845_s5, %s845_s5 }
  0x26   :  { %p852_p4 = por %p851_p3, %p850_p2 }
  0x28   :  { %p853_p5 = pnand %p852_p4, %p846_p1 }
  0x2a   :  { %856 = shalt.err (!%p853_p5)
}
  0x2b   :  { %56 = dma.hbm_to_vmem [thread:$0]  %s1085_s4, 1024, %s51_s20, [#allocation6], %s907_s10, %s907_s10, %s908_s11  }
  0x2c   :  { %s911_s25 = smov [#allocation10]  }
  0x2d   :  { %s74_s26 = sshll.u32 %s911_s25, 4  ;;  %s75_s26 = int_to_ptr.vmem [resolvable:$true] %s74_s26 }
  0x2e   :  { %s865_s27 = scalar_lea.vmem %s75_s26, 2048  ;;  %p870_p7 = scmp.lt.s32.totalorder %s75_s26, %s75_s26 }
  0x2f   :  { %p866_p6 = scmp.ne.s32.totalorder %s75_s26, %s865_s27  ;;  %p871_p8 = scmp.lt.s32.totalorder %s865_s27, %s865_s27 }
  0x31   :  { %p872_p9 = por %p871_p8, %p870_p7 }
  0x33   :  { %p873_p10 = pnand %p872_p9, %p866_p6 }
  0x35   :  { %876 = shalt.err (!%p873_p10)
}
  0x36   :  { %80 = dma.hbm_to_vmem [thread:$0]  %s1087_s6, 2048, %s75_s26, [#allocation9], %s907_s10, %s907_s10, %s908_s11  }
  0x37   :  { %897 = dma.done.wait [#allocation3], 1024  }
  0x38   :  { %898 = vsyncadd [#allocation3], 4294966272 }
  0x39   :  { %899 = dma.done.wait [#allocation6], 2048  }
  0x3a   :  { %900 = vsyncadd [#allocation6], 4294965248 }
  0x3b   :  { %901 = dma.done.wait [#allocation9], 4096  }
  0x3c   :  { %902 = vsyncadd [#allocation9], 4294963200  ;;  %v912_v0 = vmov 0   ;;  %v913_v1 = vmov 0.0   ;;  %vm914_vm0 = vmmov 0   ;;  %v99_v2 = vld [vmem:[%s1082_s1] sm:$0xff] }
  0x3d   :  { %776 = vset.pattern.permute.xlu0 %v912_v0  ;;  %638 = vmatprep.subr.mxu0 %v913_v1  ;;  %v111_v3 = vld [vmem:[#allocation7 + $0x38] sm:$0xff]  ;;  %v110_v4 = vld [vmem:[#allocation7 + $0x30] sm:$0xff]  ;;  %v109_v5 = vld [vmem:[#allocation7 + $0x28] sm:$0xff]  ;;  %vm112_vm1 = vcmask 523264   ;;  %s915_s15 = smov [#allocation11]  }
  0x3e   :  { %654 = vmatprep.mubr.msk.f32.mxu0 %vm914_vm0, %v913_v1  ;;  %657 = vmatprep.subr.mxu1 %v913_v1  ;;  %v200_v6 = vld [vmem:[#allocation2 + $0x38] sm:$0xff]  ;;  %v199_v7 = vld [vmem:[#allocation2 + $0x30] sm:$0xff]  ;;  %v108_v8 = vld [vmem:[#allocation7 + $0x20] sm:$0xff]  ;;  %s559_s16 = sshll.u32 %s915_s15, 4  ;;  %s560_s16 = int_to_ptr.vmem [resolvable:$true] %s559_s16 }
  0x3f   :  { %673 = vmatprep.mubr.msk.f32.mxu1 %vm914_vm0, %v913_v1  ;;  %188 = vperm.xlu0 %776, %v99_v2   ;;  %v198_v9 = vld [vmem:[#allocation2 + $0x28] sm:$0xff]  ;;  %v107_v10 = vld [vmem:[#allocation7 + $0x18] sm:$0xff]  ;;  %v197_v11 = vld [vmem:[#allocation2 + $0x20] sm:$0xff]  ;;  %s877_s17 = scalar_lea.vmem %s560_s16, 128  ;;  %p882_p12 = scmp.lt.s32.totalorder %s560_s16, %s560_s16 }
  0x40   :  { %639 = vmatpush3.msra.mxu0 %v111_v3  ;;  %658 = vmatpush3.msra.mxu1 %v200_v6  ;;  %v106_v12 = vld [vmem:[#allocation7 + $0x10] sm:$0xff]  ;;  %v196_v13 = vld [vmem:[#allocation2 + $0x18] sm:$0xff]  ;;  %v105_v14 = vld [vmem:[#allocation7 + $0x8] sm:$0xff]  ;;  %p878_p11 = scmp.ne.s32.totalorder %s560_s16, %s877_s17  ;;  %p883_p13 = scmp.lt.s32.totalorder %s877_s17, %s877_s17 }
  0x41   :  { %640 = vmatprep.subr.mxu0 %v913_v1  ;;  %659 = vmatprep.subr.mxu1 %v913_v1  ;;  %v195_v15 = vld [vmem:[#allocation2 + $0x10] sm:$0xff]  ;;  %v104_v16 = vld [vmem:[#allocation7] sm:$0xff]  ;;  %v282_v18 = vld [vmem:[#allocation5 + $0x38] sm:$0xff] }
  0x42   :  { %641 = vmatpush3.msra.mxu0 %v110_v4  ;;  %660 = vmatpush3.msra.mxu1 %v199_v7  ;;  %v98_v17 = vld [vmem:[%s1081_s0] sm:$0xff]  ;;  %v194_v19 = vld [vmem:[#allocation2 + $0x8] sm:$0xff]  ;;  %v281_v20 = vld [vmem:[#allocation5 + $0x30] sm:$0xff]  ;;  %p884_p0 = por %p883_p13, %p882_p12 }
  0x43   :  { %642 = vmatprep.subr.mxu0 %v913_v1  ;;  %661 = vmatprep.subr.mxu1 %v913_v1  ;;  %v193_v21 = vld [vmem:[#allocation2] sm:$0xff]  ;;  %v280_v22 = vld [vmem:[#allocation5 + $0x28] sm:$0xff]  ;;  %v278_v24 = vld [vmem:[#allocation5 + $0x18] sm:$0xff] }
  0x44   :  { %643 = vmatpush3.msra.mxu0 %v109_v5  ;;  %662 = vmatpush3.msra.mxu1 %v198_v9  ;;  %v279_v23 = vld [vmem:[#allocation5 + $0x20] sm:$0xff]  ;;  %v277_v25 = vld [vmem:[#allocation5 + $0x10] sm:$0xff]  ;;  %v276_v26 = vld [vmem:[#allocation5 + $0x8] sm:$0xff]  ;;  %p885_p1 = pnand %p884_p0, %p878_p11 }
  0x45   :  { %644 = vmatprep.subr.mxu0 %v913_v1  ;;  %663 = vmatprep.subr.mxu1 %v913_v1  ;;  %v275_v27 = vld [vmem:[#allocation5] sm:$0xff]  ;;  %v384_v29 = vld [vmem:[#allocation8 + $0x78] sm:$0xff]  ;;  %v383_v32 = vld [vmem:[#allocation8 + $0x70] sm:$0xff] }
  0x46   :  { %645 = vmatpush3.msra.mxu0 %v108_v8  ;;  %664 = vmatpush3.msra.mxu1 %v197_v11  ;;  %v382_v33 = vld [vmem:[#allocation8 + $0x68] sm:$0xff]  ;;  %v381_v34 = vld [vmem:[#allocation8 + $0x60] sm:$0xff]  ;;  %v380_v35 = vld [vmem:[#allocation8 + $0x58] sm:$0xff] }
  0x47   :  { %646 = vmatprep.subr.mxu0 %v913_v1  ;;  %665 = vmatprep.subr.mxu1 %v913_v1  ;;  %v379_v36 = vld [vmem:[#allocation8 + $0x50] sm:$0xff]  ;;  %v378_v37 = vld [vmem:[#allocation8 + $0x48] sm:$0xff]  ;;  %v377_v38 = vld [vmem:[#allocation8 + $0x40] sm:$0xff] }
  0x48   :  { %647 = vmatpush3.msra.mxu0 %v107_v10  ;;  %666 = vmatpush3.msra.mxu1 %v196_v13  ;;  %v376_v39 = vld [vmem:[#allocation8 + $0x38] sm:$0xff]  ;;  %v375_v40 = vld [vmem:[#allocation8 + $0x30] sm:$0xff]  ;;  %v374_v41 = vld [vmem:[#allocation8 + $0x28] sm:$0xff] }
  0x49   :  { %648 = vmatprep.subr.mxu0 %v913_v1  ;;  %667 = vmatprep.subr.mxu1 %v913_v1  ;;  %v373_v42 = vld [vmem:[#allocation8 + $0x20] sm:$0xff]  ;;  %v372_v43 = vld [vmem:[#allocation8 + $0x18] sm:$0xff]  ;;  %v371_v44 = vld [vmem:[#allocation8 + $0x10] sm:$0xff] }
  0x4a   :  { %649 = vmatpush3.msra.mxu0 %v106_v12  ;;  %668 = vmatpush3.msra.mxu1 %v195_v15  ;;  %v370_v45 = vld [vmem:[#allocation8 + $0x8] sm:$0xff]  ;;  %v369_v46 = vld [vmem:[#allocation8] sm:$0xff]  ;;  %v475_v47 = vld [vmem:[#allocation10 + $0x78] sm:$0xff] }
  0x4b   :  { %650 = vmatprep.subr.mxu0 %v913_v1  ;;  %669 = vmatprep.subr.mxu1 %v913_v1  ;;  %v474_v48 = vld [vmem:[#allocation10 + $0x70] sm:$0xff]  ;;  %v473_v49 = vld [vmem:[#allocation10 + $0x68] sm:$0xff]  ;;  %v472_v50 = vld [vmem:[#allocation10 + $0x60] sm:$0xff] }
  0x4c   :  { %651 = vmatpush3.msra.mxu0 %v105_v14  ;;  %670 = vmatpush3.msra.mxu1 %v194_v19  ;;  %v471_v52 = vld [vmem:[#allocation10 + $0x58] sm:$0xff]  ;;  %v470_v54 = vld [vmem:[#allocation10 + $0x50] sm:$0xff]  ;;  %v469_v55 = vld [vmem:[#allocation10 + $0x48] sm:$0xff] }
  0x4d   :  { %652 = vmatprep.subr.mxu0 %v913_v1  ;;  %671 = vmatprep.subr.mxu1 %v913_v1  ;;  %v468_v56 = vld [vmem:[#allocation10 + $0x40] sm:$0xff]  ;;  %v467_v57 = vld [vmem:[#allocation10 + $0x38] sm:$0xff]  ;;  %v466_v58 = vld [vmem:[#allocation10 + $0x30] sm:$0xff] }
  0x4e   :  { %653 = vmatpush3.msra.mxu0 %v104_v16  ;;  %672 = vmatpush3.msra.mxu1 %v193_v21  ;;  %v465_v59 = vld [vmem:[#allocation10 + $0x28] sm:$0xff]  ;;  %v464_v60 = vld [vmem:[#allocation10 + $0x20] sm:$0xff]  ;;  %v463_v61 = vld [vmem:[#allocation10 + $0x18] sm:$0xff] }
  0x4f   :  { %655 = vmatmul.mubr.msk.f32.vlgmr.msra.gmra.mxu0 %vm112_vm1, %v98_v17  ;;  %676 = vmatprep.subr.mxu0 %v913_v1  ;;  %v573_v4 = vld [vmem:[%s1088_s7 + $0x1] ss:$0 sm:$0xff]  ;;  %v574_v7 = vld [vmem:[%s1088_s7 + $0x2] ss:$0 sm:$0xff]  ;;  %v462_v10 = vld [vmem:[#allocation10 + $0x10] sm:$0xff] }
  0x50   :  { %677 = vmatpush3.msra.mxu0 %v282_v18  ;;  %692 = vmatprep.mubr.msk.f32.mxu0 %vm914_vm0, %v913_v1  ;;  %v461_v11 = vld [vmem:[#allocation10 + $0x8] sm:$0xff]  ;;  %v460_v12 = vld [vmem:[#allocation10] sm:$0xff] }
  0x51   :  { %678 = vmatprep.subr.mxu0 %v913_v1  ;;  %695 = vmatprep.subr.mxu1 %v913_v1  ;;  %v575_v13 = vld [vmem:[%s1088_s7 + $0x3] ss:$0 sm:$0xff]  ;;  %v576_v18 = vld [vmem:[%s1088_s7] ss:$0 sm:$0xff] }
  0x52   :  { %679 = vmatpush3.msra.mxu0 %v281_v20 }
  0x53   :  { %680 = vmatprep.subr.mxu0 %v913_v1 }
  0x54   :  { %681 = vmatpush3.msra.mxu0 %v280_v22 }
  0x55   :  { %682 = vmatprep.subr.mxu0 %v913_v1 }
  0x56   :  { %683 = vmatpush3.msra.mxu0 %v279_v23 }
  0x57   :  { %684 = vmatprep.subr.mxu0 %v913_v1 }
  0x58   :  { %685 = vmatpush3.msra.mxu0 %v278_v24 }
  0x59   :  { %686 = vmatprep.subr.mxu0 %v913_v1 }
  0x5a   :  { %687 = vmatpush3.msra.mxu0 %v277_v25 }
  0x5b   :  { %688 = vmatprep.subr.mxu0 %v913_v1 }
  0x5c   :  { %689 = vmatpush3.msra.mxu0 %v276_v26 }
  0x5d   :  { %690 = vmatprep.subr.mxu0 %v913_v1 }
  0x5e   :  { %691 = vmatpush3.msra.mxu0 %v275_v27 }
  0x5f   :  { %730 = vmatprep.subr.mxu0 %v913_v1 }
  0xba   :  { %v189_v28 = vpop.permute.xlu0 %188 }
  0xbb   :  { %vm191_vm2 = vcmp.ge.f32.partialorder %v98_v17, %v189_v28 }
  0xbc   :  { %v192_v30 = vsel %vm191_vm2, %v98_v17, 0.0 }
  0xbd   :  { %v274_v31 = vmul.f32 %v192_v30, %v192_v30  ;;  %674 = vmatmul.mubr.msk.f32.vlgmr.msra.gmra.mxu1 %vm112_vm1, %v192_v30 }
  0xbe   :  { %696 = vmatpush3.msra.mxu1 %v384_v29  ;;  %727 = vmatprep.mubr.msk.f32.mxu1 %vm914_vm0, %v913_v1 }
  0xbf   :  { %693 = vmatmul.mubr.msk.f32.vlgmr.msra.gmra.mxu0 %vm112_vm1, %v274_v31  ;;  %697 = vmatprep.subr.mxu1 %v913_v1 }
  0xc0   :  { %698 = vmatpush3.msra.mxu1 %v383_v32  ;;  %762 = vmatprep.mubr.msk.f32.mxu0 %vm914_vm0, %v913_v1 }
  0xc1   :  { %699 = vmatprep.subr.mxu1 %v913_v1  ;;  %731 = vmatpush3.msra.mxu0 %v475_v47 }
  0xc2   :  { %700 = vmatpush3.msra.mxu1 %v382_v33  ;;  %732 = vmatprep.subr.mxu0 %v913_v1 }
  0xc3   :  { %701 = vmatprep.subr.mxu1 %v913_v1  ;;  %733 = vmatpush3.msra.mxu0 %v474_v48 }
  0xc4   :  { %702 = vmatpush3.msra.mxu1 %v381_v34  ;;  %734 = vmatprep.subr.mxu0 %v913_v1 }
  0xc5   :  { %703 = vmatprep.subr.mxu1 %v913_v1  ;;  %735 = vmatpush3.msra.mxu0 %v473_v49 }
  0xc6   :  { %704 = vmatpush3.msra.mxu1 %v380_v35  ;;  %736 = vmatprep.subr.mxu0 %v913_v1 }
  0xc7   :  { %705 = vmatprep.subr.mxu1 %v913_v1  ;;  %737 = vmatpush3.msra.mxu0 %v472_v50 }
  0xc8   :  { %706 = vmatpush3.msra.mxu1 %v379_v36  ;;  %738 = vmatprep.subr.mxu0 %v913_v1 }
  0xc9   :  { %707 = vmatprep.subr.mxu1 %v913_v1  ;;  %739 = vmatpush3.msra.mxu0 %v471_v52 }
  0xca   :  { %708 = vmatpush3.msra.mxu1 %v378_v37  ;;  %740 = vmatprep.subr.mxu0 %v913_v1 }
  0xcb   :  { %709 = vmatprep.subr.mxu1 %v913_v1  ;;  %741 = vmatpush3.msra.mxu0 %v470_v54 }
  0xcc   :  { %710 = vmatpush3.msra.mxu1 %v377_v38  ;;  %742 = vmatprep.subr.mxu0 %v913_v1 }
  0xcd   :  { %711 = vmatprep.subr.mxu1 %v913_v1  ;;  %743 = vmatpush3.msra.mxu0 %v469_v55 }
  0xce   :  { %712 = vmatpush3.msra.mxu1 %v376_v39  ;;  %744 = vmatprep.subr.mxu0 %v913_v1 }
  0xcf   :  { %713 = vmatprep.subr.mxu1 %v913_v1  ;;  %745 = vmatpush3.msra.mxu0 %v468_v56 }
  0xd0   :  { %714 = vmatpush3.msra.mxu1 %v375_v40  ;;  %746 = vmatprep.subr.mxu0 %v913_v1 }
  0xd1   :  { %715 = vmatprep.subr.mxu1 %v913_v1  ;;  %747 = vmatpush3.msra.mxu0 %v467_v57 }
  0xd2   :  { %716 = vmatpush3.msra.mxu1 %v374_v41  ;;  %748 = vmatprep.subr.mxu0 %v913_v1 }
  0xd3   :  { %717 = vmatprep.subr.mxu1 %v913_v1  ;;  %749 = vmatpush3.msra.mxu0 %v466_v58 }
  0xd4   :  { %718 = vmatpush3.msra.mxu1 %v373_v42  ;;  %750 = vmatprep.subr.mxu0 %v913_v1 }
  0xd5   :  { %719 = vmatprep.subr.mxu1 %v913_v1  ;;  %751 = vmatpush3.msra.mxu0 %v465_v59 }
  0xd6   :  { %720 = vmatpush3.msra.mxu1 %v372_v43  ;;  %752 = vmatprep.subr.mxu0 %v913_v1 }
  0xd7   :  { %721 = vmatprep.subr.mxu1 %v913_v1  ;;  %753 = vmatpush3.msra.mxu0 %v464_v60 }
  0xd8   :  { %722 = vmatpush3.msra.mxu1 %v371_v44  ;;  %754 = vmatprep.subr.mxu0 %v913_v1 }
  0xd9   :  { %723 = vmatprep.subr.mxu1 %v913_v1  ;;  %755 = vmatpush3.msra.mxu0 %v463_v61 }
  0xda   :  { %724 = vmatpush3.msra.mxu1 %v370_v45  ;;  %756 = vmatprep.subr.mxu0 %v913_v1 }
  0xdb   :  { %725 = vmatprep.subr.mxu1 %v913_v1  ;;  %757 = vmatpush3.msra.mxu0 %v462_v10 }
  0xdc   :  { %726 = vmatpush3.msra.mxu1 %v369_v46  ;;  %758 = vmatprep.subr.mxu0 %v913_v1 }
  0xdd   :  { %759 = vmatpush3.msra.mxu0 %v461_v11 }
  0xde   :  { %760 = vmatprep.subr.mxu0 %v913_v1 }
  0xdf   :  { %761 = vmatpush3.msra.mxu0 %v460_v12 }
 0x10f   :  { %v182_v51 = vpop.f32.mrf.mxu0 }
 0x110   :  { %v550_v19 = vadd.f32 %v576_v18, %v182_v51 }
 0x111   :  { %v656_v53 = vpop.f32.mrf.mxu0 }
 0x17d   :  { %v270_v62 = vpop.f32.mrf.mxu1 }
 0x17e   :  { %v356_v63 = vmul.f32 %v270_v62, %v270_v62 }
 0x17f   :  { %v675_v0 = vpop.f32.mrf.mxu1  ;;  %v352_v2 = vpop.f32.mrf.mxu0 }
 0x180   :  { %v357_v3 = vsub.f32 %v356_v63, %v352_v2 }
 0x181   :  { %v694_v5 = vpop.f32.mrf.mxu0 }
 0x182   :  { %v358_v6 = vmul.f32 0.5, %v357_v3 }
 0x184   :  { %v363_v8 = vmul.f32 %v573_v4, %v358_v6 }
 0x186   :  { %v368_v9 = vadd.f32 %v574_v7, %v363_v8 }
 0x188   :  { %728 = vmatmul.mubr.f32.vlgmr.msra.gmra.mxu1 %v368_v9 }
 0x248   :  { %v455_v14 = vpop.f32.mrf.mxu1 }
 0x249   :  { %v456_v15 = vadd.f32 %v575_v13, %v455_v14 }
 0x24a   :  { %v729_v16 = vpop.f32.mrf.mxu1 }
 0x24b   :  { %v459_v17 = vmax.f32 %v456_v15, 0.0 }
 0x24d   :  { %763 = vmatmul.mubr.f32.vlgmr.msra.gmra.mxu0 %v459_v17 }
 0x30d   :  { %v542_v20 = vpop.f32.mrf.mxu0 }
 0x30e   :  { %v551_v1 = vadd.f32 %v550_v19, %v542_v20 }
 0x30f   :  { %v764_v21 = vpop.f32.mrf.mxu0 }
 0x310   :  { %552 = vst [vmem:[#allocation11] sm:$0xff] %v551_v1 }
 0x311   :  { %888 = shalt.err (!%p885_p1)
}
 0x312   :  { %562 = dma.vmem_to_hbm [thread:$0]  %s560_s16, 128, %s1089_s8, [#allocation4]  }
 0x313   :  { %903 = dma.done.wait [#allocation4], 128  }
 0x314   :  { %904 = vsyncadd [#allocation4], 4294967168 }
 0x315   :  { %566 = vsyncpa [#allocation3], 1 }
 0x316   :  { %567 = vsyncpa [#allocation6], 1 }
 0x317   :  { %568 = vsyncpa [#allocation9], 1 }
 0x318   :  { %569 = vsyncpa [#allocation4], 1 }

// kernel: tpu_custom_call.1
= control target key start
LH: loop header
LB: loop body
LE: loop exit
PB: predicated region body
PF: predicated region fallthrough
CT: control target
= control target key end

     0   :  { %13 = vsyncpa [#allocation3], 0  ;;  %s1081_s0 = inlined_call_operand.vmem [shape: f32[8,64], index: 0, kind: input, shape index: {}]   ;;  %s1082_s1 = inlined_call_operand.vmem [shape: f32[8,1], index: 1, kind: input, shape index: {}]   ;;  %s1083_s2 = inlined_call_operand.hbm [shape: f32[64,128], index: 2, kind: input, shape index: {}]   ;;  %s1084_s3 = inlined_call_operand.hbm [shape: f32[64,128], index: 3, kind: input, shape index: {}]   ;;  %s1085_s4 = inlined_call_operand.hbm [shape: f32[64,128], index: 4, kind: input, shape index: {}]   ;;  %s1086_s5 = inlined_call_operand.hbm [shape: f32[128,128], index: 5, kind: input, shape index: {}]   ;;  %s1087_s6 = inlined_call_operand.hbm [shape: f32[128,128], index: 6, kind: input, shape index: {}]   ;;  %s1088_s7 = inlined_call_operand.vmem [shape: f32[8,128], index: 7, kind: input, shape index: {}]   ;;  %s1089_s8 = inlined_call_operand.hbm [shape: f32[8,128], index: 8, kind: output, shape index: {}]  }
   0x1   :  { %14 = vsyncpa [#allocation6], 0 }
   0x2   :  { %15 = vsyncpa [#allocation9], 0 }
   0x3   :  { %16 = vsyncpa [#allocation4], 0  ;;  %s905_s27 = smov [#allocation5]   ;;  %s906_s29 = smov [#allocation8]  }
   0x4   :  { %s38_s28 = sshll.u32 %s905_s27, 4  ;;  %s62_s30 = sshll.u32 %s906_s29, 4  ;;  %s39_s28 = int_to_ptr.vmem [resolvable:$true] %s38_s28  ;;  %s63_s30 = int_to_ptr.vmem [resolvable:$true] %s62_s30 }
   0x5   :  { %s785_s9 = scalar_lea.vmem %s39_s28, 1024  ;;  %p790_p1 = scmp.lt.s32.totalorder %s39_s28, %s39_s28 }
   0x6   :  { %p786_p0 = scmp.ne.s32.totalorder %s39_s28, %s785_s9  ;;  %p791_p2 = scmp.lt.s32.totalorder %s785_s9, %s785_s9 }
   0x8   :  { %p792_p3 = por %p791_p2, %p790_p1 }
   0xa   :  { %p793_p4 = pnand %p792_p3, %p786_p0 }
   0xc   :  { %796 = shalt.err (!%p793_p4)
}
   0xd   :  { %s907_s10 = smov 128   ;;  %s908_s11 = smov 8  }
   0xe   :  { %44 = dma.hbm_to_vmem [thread:$0]  %s1084_s3, 1024, %s39_s28, [#allocation6], %s907_s10, %s907_s10, %s908_s11  }
   0xf   :  { %s805_s14 = scalar_lea.vmem %s63_s30, 2048  ;;  %p810_p6 = scmp.lt.s32.totalorder %s63_s30, %s63_s30 }
  0x10   :  { %p806_p5 = scmp.ne.s32.totalorder %s63_s30, %s805_s14  ;;  %p811_p7 = scmp.lt.s32.totalorder %s805_s14, %s805_s14 }
  0x12   :  { %p812_p8 = por %p811_p7, %p810_p6 }
  0x14   :  { %p813_p9 = pnand %p812_p8, %p806_p5 }
  0x16   :  { %816 = shalt.err (!%p813_p9)
}
  0x17   :  { %68 = dma.hbm_to_vmem [thread:$0]  %s1086_s5, 2048, %s63_s30, [#allocation9], %s907_s10, %s907_s10, %s908_s11  }
  0x18   :  { %s909_s17 = smov [#allocation2]   ;;  %s910_s19 = smov [#allocation7]  }
  0x19   :  { %s26_s18 = sshll.u32 %s909_s17, 4  ;;  %s50_s20 = sshll.u32 %s910_s19, 4  ;;  %s27_s18 = int_to_ptr.vmem [resolvable:$true] %s26_s18  ;;  %s51_s20 = int_to_ptr.vmem [resolvable:$true] %s50_s20 }
  0x1a   :  { %s825_s3 = scalar_lea.vmem %s27_s18, 1024  ;;  %p830_p11 = scmp.lt.s32.totalorder %s27_s18, %s27_s18 }
  0x1b   :  { %p826_p10 = scmp.ne.s32.totalorder %s27_s18, %s825_s3  ;;  %p831_p12 = scmp.lt.s32.totalorder %s825_s3, %s825_s3 }
  0x1d   :  { %p832_p13 = por %p831_p12, %p830_p11 }
  0x1f   :  { %p833_p0 = pnand %p832_p13, %p826_p10 }
  0x21   :  { %836 = shalt.err (!%p833_p0)
}
  0x22   :  { %32 = dma.hbm_to_vmem [thread:$0]  %s1083_s2, 1024, %s27_s18, [#allocation3], %s907_s10, %s907_s10, %s908_s11  }
  0x23   :  { %s845_s5 = scalar_lea.vmem %s51_s20, 1024  ;;  %p850_p2 = scmp.lt.s32.totalorder %s51_s20, %s51_s20 }
  0x24   :  { %p846_p1 = scmp.ne.s32.totalorder %s51_s20, %s845_s5  ;;  %p851_p3 = scmp.lt.s32.totalorder %s845_s5, %s845_s5 }
  0x26   :  { %p852_p4 = por %p851_p3, %p850_p2 }
  0x28   :  { %p853_p5 = pnand %p852_p4, %p846_p1 }
  0x2a   :  { %856 = shalt.err (!%p853_p5)
}
  0x2b   :  { %56 = dma.hbm_to_vmem [thread:$0]  %s1085_s4, 1024, %s51_s20, [#allocation6], %s907_s10, %s907_s10, %s908_s11  }
  0x2c   :  { %s911_s25 = smov [#allocation10]  }
  0x2d   :  { %s74_s26 = sshll.u32 %s911_s25, 4  ;;  %s75_s26 = int_to_ptr.vmem [resolvable:$true] %s74_s26 }
  0x2e   :  { %s865_s27 = scalar_lea.vmem %s75_s26, 2048  ;;  %p870_p7 = scmp.lt.s32.totalorder %s75_s26, %s75_s26 }
  0x2f   :  { %p866_p6 = scmp.ne.s32.totalorder %s75_s26, %s865_s27  ;;  %p871_p8 = scmp.lt.s32.totalorder %s865_s27, %s865_s27 }
  0x31   :  { %p872_p9 = por %p871_p8, %p870_p7 }
  0x33   :  { %p873_p10 = pnand %p872_p9, %p866_p6 }
  0x35   :  { %876 = shalt.err (!%p873_p10)
}
  0x36   :  { %80 = dma.hbm_to_vmem [thread:$0]  %s1087_s6, 2048, %s75_s26, [#allocation9], %s907_s10, %s907_s10, %s908_s11  }
  0x37   :  { %897 = dma.done.wait [#allocation3], 1024  }
  0x38   :  { %898 = vsyncadd [#allocation3], 4294966272 }
  0x39   :  { %899 = dma.done.wait [#allocation6], 2048  }
  0x3a   :  { %900 = vsyncadd [#allocation6], 4294965248 }
  0x3b   :  { %901 = dma.done.wait [#allocation9], 4096  }
  0x3c   :  { %902 = vsyncadd [#allocation9], 4294963200  ;;  %v912_v0 = vmov 0   ;;  %v913_v1 = vmov 0.0   ;;  %vm914_vm0 = vmmov 0   ;;  %v99_v2 = vld [vmem:[%s1082_s1] sm:$0xff] }
  0x3d   :  { %776 = vset.pattern.permute.xlu0 %v912_v0  ;;  %638 = vmatprep.subr.mxu0 %v913_v1  ;;  %v111_v3 = vld [vmem:[#allocation7 + $0x38] sm:$0xff]  ;;  %v110_v4 = vld [vmem:[#allocation7 + $0x30] sm:$0xff]  ;;  %v109_v5 = vld [vmem:[#allocation7 + $0x28] sm:$0xff]  ;;  %vm112_vm1 = vcmask 523264   ;;  %s915_s15 = smov [#allocation11]  }
  0x3e   :  { %654 = vmatprep.mubr.msk.f32.mxu0 %vm914_vm0, %v913_v1  ;;  %657 = vmatprep.subr.mxu1 %v913_v1  ;;  %v200_v6 = vld [vmem:[#allocation2 + $0x38] sm:$0xff]  ;;  %v199_v7 = vld [vmem:[#allocation2 + $0x30] sm:$0xff]  ;;  %v108_v8 = vld [vmem:[#allocation7 + $0x20] sm:$0xff]  ;;  %s559_s16 = sshll.u32 %s915_s15, 4  ;;  %s560_s16 = int_to_ptr.vmem [resolvable:$true] %s559_s16 }
  0x3f   :  { %673 = vmatprep.mubr.msk.f32.mxu1 %vm914_vm0, %v913_v1  ;;  %188 = vperm.xlu0 %776, %v99_v2   ;;  %v198_v9 = vld [vmem:[#allocation2 + $0x28] sm:$0xff]  ;;  %v107_v10 = vld [vmem:[#allocation7 + $0x18] sm:$0xff]  ;;  %v197_v11 = vld [vmem:[#allocation2 + $0x20] sm:$0xff]  ;;  %s877_s17 = scalar_lea.vmem %s560_s16, 128  ;;  %p882_p12 = scmp.lt.s32.totalorder %s560_s16, %s560_s16 }
  0x40   :  { %639 = vmatpush3.msra.mxu0 %v111_v3  ;;  %658 = vmatpush3.msra.mxu1 %v200_v6  ;;  %v106_v12 = vld [vmem:[#allocation7 + $0x10] sm:$0xff]  ;;  %v196_v13 = vld [vmem:[#allocation2 + $0x18] sm:$0xff]  ;;  %v105_v14 = vld [vmem:[#allocation7 + $0x8] sm:$0xff]  ;;  %p878_p11 = scmp.ne.s32.totalorder %s560_s16, %s877_s17  ;;  %p883_p13 = scmp.lt.s32.totalorder %s877_s17, %s877_s17 }
  0x41   :  { %640 = vmatprep.subr.mxu0 %v913_v1  ;;  %659 = vmatprep.subr.mxu1 %v913_v1  ;;  %v195_v15 = vld [vmem:[#allocation2 + $0x10] sm:$0xff]  ;;  %v104_v16 = vld [vmem:[#allocation7] sm:$0xff]  ;;  %v282_v18 = vld [vmem:[#allocation5 + $0x38] sm:$0xff] }
  0x42   :  { %641 = vmatpush3.msra.mxu0 %v110_v4  ;;  %660 = vmatpush3.msra.mxu1 %v199_v7  ;;  %v98_v17 = vld [vmem:[%s1081_s0] sm:$0xff]  ;;  %v194_v19 = vld [vmem:[#allocation2 + $0x8] sm:$0xff]  ;;  %v281_v20 = vld [vmem:[#allocation5 + $0x30] sm:$0xff]  ;;  %p884_p0 = por %p883_p13, %p882_p12 }
  0x43   :  { %642 = vmatprep.subr.mxu0 %v913_v1  ;;  %661 = vmatprep.subr.mxu1 %v913_v1  ;;  %v193_v21 = vld [vmem:[#allocation2] sm:$0xff]  ;;  %v280_v22 = vld [vmem:[#allocation5 + $0x28] sm:$0xff]  ;;  %v278_v24 = vld [vmem:[#allocation5 + $0x18] sm:$0xff] }
  0x44   :  { %643 = vmatpush3.msra.mxu0 %v109_v5  ;;  %662 = vmatpush3.msra.mxu1 %v198_v9  ;;  %v279_v23 = vld [vmem:[#allocation5 + $0x20] sm:$0xff]  ;;  %v277_v25 = vld [vmem:[#allocation5 + $0x10] sm:$0xff]  ;;  %v276_v26 = vld [vmem:[#allocation5 + $0x8] sm:$0xff]  ;;  %p885_p1 = pnand %p884_p0, %p878_p11 }
  0x45   :  { %644 = vmatprep.subr.mxu0 %v913_v1  ;;  %663 = vmatprep.subr.mxu1 %v913_v1  ;;  %v275_v27 = vld [vmem:[#allocation5] sm:$0xff]  ;;  %v384_v29 = vld [vmem:[#allocation8 + $0x78] sm:$0xff]  ;;  %v383_v32 = vld [vmem:[#allocation8 + $0x70] sm:$0xff] }
  0x46   :  { %645 = vmatpush3.msra.mxu0 %v108_v8  ;;  %664 = vmatpush3.msra.mxu1 %v197_v11  ;;  %v382_v33 = vld [vmem:[#allocation8 + $0x68] sm:$0xff]  ;;  %v381_v34 = vld [vmem:[#allocation8 + $0x60] sm:$0xff]  ;;  %v380_v35 = vld [vmem:[#allocation8 + $0x58] sm:$0xff] }
  0x47   :  { %646 = vmatprep.subr.mxu0 %v913_v1  ;;  %665 = vmatprep.subr.mxu1 %v913_v1  ;;  %v379_v36 = vld [vmem:[#allocation8 + $0x50] sm:$0xff]  ;;  %v378_v37 = vld [vmem:[#allocation8 + $0x48] sm:$0xff]  ;;  %v377_v38 = vld [vmem:[#allocation8 + $0x40] sm:$0xff] }
  0x48   :  { %647 = vmatpush3.msra.mxu0 %v107_v10  ;;  %666 = vmatpush3.msra.mxu1 %v196_v13  ;;  %v376_v39 = vld [vmem:[#allocation8 + $0x38] sm:$0xff]  ;;  %v375_v40 = vld [vmem:[#allocation8 + $0x30] sm:$0xff]  ;;  %v374_v41 = vld [vmem:[#allocation8 + $0x28] sm:$0xff] }
  0x49   :  { %648 = vmatprep.subr.mxu0 %v913_v1  ;;  %667 = vmatprep.subr.mxu1 %v913_v1  ;;  %v373_v42 = vld [vmem:[#allocation8 + $0x20] sm:$0xff]  ;;  %v372_v43 = vld [vmem:[#allocation8 + $0x18] sm:$0xff]  ;;  %v371_v44 = vld [vmem:[#allocation8 + $0x10] sm:$0xff] }
  0x4a   :  { %649 = vmatpush3.msra.mxu0 %v106_v12  ;;  %668 = vmatpush3.msra.mxu1 %v195_v15  ;;  %v370_v45 = vld [vmem:[#allocation8 + $0x8] sm:$0xff]  ;;  %v369_v46 = vld [vmem:[#allocation8] sm:$0xff]  ;;  %v475_v47 = vld [vmem:[#allocation10 + $0x78] sm:$0xff] }
  0x4b   :  { %650 = vmatprep.subr.mxu0 %v913_v1  ;;  %669 = vmatprep.subr.mxu1 %v913_v1  ;;  %v474_v48 = vld [vmem:[#allocation10 + $0x70] sm:$0xff]  ;;  %v473_v49 = vld [vmem:[#allocation10 + $0x68] sm:$0xff]  ;;  %v472_v50 = vld [vmem:[#allocation10 + $0x60] sm:$0xff] }
  0x4c   :  { %651 = vmatpush3.msra.mxu0 %v105_v14  ;;  %670 = vmatpush3.msra.mxu1 %v194_v19  ;;  %v471_v52 = vld [vmem:[#allocation10 + $0x58] sm:$0xff]  ;;  %v470_v54 = vld [vmem:[#allocation10 + $0x50] sm:$0xff]  ;;  %v469_v55 = vld [vmem:[#allocation10 + $0x48] sm:$0xff] }
  0x4d   :  { %652 = vmatprep.subr.mxu0 %v913_v1  ;;  %671 = vmatprep.subr.mxu1 %v913_v1  ;;  %v468_v56 = vld [vmem:[#allocation10 + $0x40] sm:$0xff]  ;;  %v467_v57 = vld [vmem:[#allocation10 + $0x38] sm:$0xff]  ;;  %v466_v58 = vld [vmem:[#allocation10 + $0x30] sm:$0xff] }
  0x4e   :  { %653 = vmatpush3.msra.mxu0 %v104_v16  ;;  %672 = vmatpush3.msra.mxu1 %v193_v21  ;;  %v465_v59 = vld [vmem:[#allocation10 + $0x28] sm:$0xff]  ;;  %v464_v60 = vld [vmem:[#allocation10 + $0x20] sm:$0xff]  ;;  %v463_v61 = vld [vmem:[#allocation10 + $0x18] sm:$0xff] }
  0x4f   :  { %655 = vmatmul.mubr.msk.f32.vlgmr.msra.gmra.mxu0 %vm112_vm1, %v98_v17  ;;  %676 = vmatprep.subr.mxu0 %v913_v1  ;;  %v573_v4 = vld [vmem:[%s1088_s7 + $0x1] ss:$0 sm:$0xff]  ;;  %v574_v7 = vld [vmem:[%s1088_s7 + $0x2] ss:$0 sm:$0xff]  ;;  %v462_v10 = vld [vmem:[#allocation10 + $0x10] sm:$0xff] }
  0x50   :  { %677 = vmatpush3.msra.mxu0 %v282_v18  ;;  %692 = vmatprep.mubr.msk.f32.mxu0 %vm914_vm0, %v913_v1  ;;  %v461_v11 = vld [vmem:[#allocation10 + $0x8] sm:$0xff]  ;;  %v460_v12 = vld [vmem:[#allocation10] sm:$0xff] }
  0x51   :  { %678 = vmatprep.subr.mxu0 %v913_v1  ;;  %695 = vmatprep.subr.mxu1 %v913_v1  ;;  %v575_v13 = vld [vmem:[%s1088_s7 + $0x3] ss:$0 sm:$0xff]  ;;  %v576_v18 = vld [vmem:[%s1088_s7] ss:$0 sm:$0xff] }
  0x52   :  { %679 = vmatpush3.msra.mxu0 %v281_v20 }
  0x53   :  { %680 = vmatprep.subr.mxu0 %v913_v1 }
  0x54   :  { %681 = vmatpush3.msra.mxu0 %v280_v22 }
  0x55   :  { %682 = vmatprep.subr.mxu0 %v913_v1 }
  0x56   :  { %683 = vmatpush3.msra.mxu0 %v279_v23 }
  0x57   :  { %684 = vmatprep.subr.mxu0 %v913_v1 }
  0x58   :  { %685 = vmatpush3.msra.mxu0 %v278_v24 }
  0x59   :  { %686 = vmatprep.subr.mxu0 %v913_v1 }
  0x5a   :  { %687 = vmatpush3.msra.mxu0 %v277_v25 }
  0x5b   :  { %688 = vmatprep.subr.mxu0 %v913_v1 }
  0x5c   :  { %689 = vmatpush3.msra.mxu0 %v276_v26 }
  0x5d   :  { %690 = vmatprep.subr.mxu0 %v913_v1 }
  0x5e   :  { %691 = vmatpush3.msra.mxu0 %v275_v27 }
  0x5f   :  { %730 = vmatprep.subr.mxu0 %v913_v1 }
  0xba   :  { %v189_v28 = vpop.permute.xlu0 %188 }
  0xbb   :  { %vm191_vm2 = vcmp.ge.f32.partialorder %v98_v17, %v189_v28 }
  0xbc   :  { %v192_v30 = vsel %vm191_vm2, %v98_v17, 0.0 }
  0xbd   :  { %v274_v31 = vmul.f32 %v192_v30, %v192_v30  ;;  %674 = vmatmul.mubr.msk.f32.vlgmr.msra.gmra.mxu1 %vm112_vm1, %v192_v30 }
  0xbe   :  { %696 = vmatpush3.msra.mxu1 %v384_v29  ;;  %727 = vmatprep.mubr.msk.f32.mxu1 %vm914_vm0, %v913_v1 }
  0xbf   :  { %693 = vmatmul.mubr.msk.f32.vlgmr.msra.gmra.mxu0 %vm112_vm1, %v274_v31  ;;  %697 = vmatprep.subr.mxu1 %v913_v1 }
  0xc0   :  { %698 = vmatpush3.msra.mxu1 %v383_v32  ;;  %762 = vmatprep.mubr.msk.f32.mxu0 %vm914_vm0, %v913_v1 }
  0xc1   :  { %699 = vmatprep.subr.mxu1 %v913_v1  ;;  %731 = vmatpush3.msra.mxu0 %v475_v47 }
  0xc2   :  { %700 = vmatpush3.msra.mxu1 %v382_v33  ;;  %732 = vmatprep.subr.mxu0 %v913_v1 }
  0xc3   :  { %701 = vmatprep.subr.mxu1 %v913_v1  ;;  %733 = vmatpush3.msra.mxu0 %v474_v48 }
  0xc4   :  { %702 = vmatpush3.msra.mxu1 %v381_v34  ;;  %734 = vmatprep.subr.mxu0 %v913_v1 }
  0xc5   :  { %703 = vmatprep.subr.mxu1 %v913_v1  ;;  %735 = vmatpush3.msra.mxu0 %v473_v49 }
  0xc6   :  { %704 = vmatpush3.msra.mxu1 %v380_v35  ;;  %736 = vmatprep.subr.mxu0 %v913_v1 }
  0xc7   :  { %705 = vmatprep.subr.mxu1 %v913_v1  ;;  %737 = vmatpush3.msra.mxu0 %v472_v50 }
  0xc8   :  { %706 = vmatpush3.msra.mxu1 %v379_v36  ;;  %738 = vmatprep.subr.mxu0 %v913_v1 }
  0xc9   :  { %707 = vmatprep.subr.mxu1 %v913_v1  ;;  %739 = vmatpush3.msra.mxu0 %v471_v52 }
  0xca   :  { %708 = vmatpush3.msra.mxu1 %v378_v37  ;;  %740 = vmatprep.subr.mxu0 %v913_v1 }
  0xcb   :  { %709 = vmatprep.subr.mxu1 %v913_v1  ;;  %741 = vmatpush3.msra.mxu0 %v470_v54 }
  0xcc   :  { %710 = vmatpush3.msra.mxu1 %v377_v38  ;;  %742 = vmatprep.subr.mxu0 %v913_v1 }
  0xcd   :  { %711 = vmatprep.subr.mxu1 %v913_v1  ;;  %743 = vmatpush3.msra.mxu0 %v469_v55 }
  0xce   :  { %712 = vmatpush3.msra.mxu1 %v376_v39  ;;  %744 = vmatprep.subr.mxu0 %v913_v1 }
  0xcf   :  { %713 = vmatprep.subr.mxu1 %v913_v1  ;;  %745 = vmatpush3.msra.mxu0 %v468_v56 }
  0xd0   :  { %714 = vmatpush3.msra.mxu1 %v375_v40  ;;  %746 = vmatprep.subr.mxu0 %v913_v1 }
  0xd1   :  { %715 = vmatprep.subr.mxu1 %v913_v1  ;;  %747 = vmatpush3.msra.mxu0 %v467_v57 }
  0xd2   :  { %716 = vmatpush3.msra.mxu1 %v374_v41  ;;  %748 = vmatprep.subr.mxu0 %v913_v1 }
  0xd3   :  { %717 = vmatprep.subr.mxu1 %v913_v1  ;;  %749 = vmatpush3.msra.mxu0 %v466_v58 }
  0xd4   :  { %718 = vmatpush3.msra.mxu1 %v373_v42  ;;  %750 = vmatprep.subr.mxu0 %v913_v1 }
  0xd5   :  { %719 = vmatprep.subr.mxu1 %v913_v1  ;;  %751 = vmatpush3.msra.mxu0 %v465_v59 }
  0xd6   :  { %720 = vmatpush3.msra.mxu1 %v372_v43  ;;  %752 = vmatprep.subr.mxu0 %v913_v1 }
  0xd7   :  { %721 = vmatprep.subr.mxu1 %v913_v1  ;;  %753 = vmatpush3.msra.mxu0 %v464_v60 }
  0xd8   :  { %722 = vmatpush3.msra.mxu1 %v371_v44  ;;  %754 = vmatprep.subr.mxu0 %v913_v1 }
  0xd9   :  { %723 = vmatprep.subr.mxu1 %v913_v1  ;;  %755 = vmatpush3.msra.mxu0 %v463_v61 }
  0xda   :  { %724 = vmatpush3.msra.mxu1 %v370_v45  ;;  %756 = vmatprep.subr.mxu0 %v913_v1 }
  0xdb   :  { %725 = vmatprep.subr.mxu1 %v913_v1  ;;  %757 = vmatpush3.msra.mxu0 %v462_v10 }
  0xdc   :  { %726 = vmatpush3.msra.mxu1 %v369_v46  ;;  %758 = vmatprep.subr.mxu0 %v913_v1 }
  0xdd   :  { %759 = vmatpush3.msra.mxu0 %v461_v11 }
  0xde   :  { %760 = vmatprep.subr.mxu0 %v913_v1 }
  0xdf   :  { %761 = vmatpush3.msra.mxu0 %v460_v12 }
 0x10f   :  { %v182_v51 = vpop.f32.mrf.mxu0 }
 0x110   :  { %v550_v19 = vadd.f32 %v576_v18, %v182_v51 }
 0x111   :  { %v656_v53 = vpop.f32.mrf.mxu0 }
 0x17d   :  { %v270_v62 = vpop.f32.mrf.mxu1 }
 0x17e   :  { %v356_v63 = vmul.f32 %v270_v62, %v270_v62 }
 0x17f   :  { %v675_v0 = vpop.f32.mrf.mxu1  ;;  %v352_v2 = vpop.f32.mrf.mxu0 }
 0x180   :  { %v357_v3 = vsub.f32 %v356_v63, %v352_v2 }
 0x181   :  { %v694_v5 = vpop.f32.mrf.mxu0 }
 0x182   :  { %v358_v6 = vmul.f32 0.5, %v357_v3 }
 0x184   :  { %v363_v8 = vmul.f32 %v573_v4, %v358_v6 }
 0x186   :  { %v368_v9 = vadd.f32 %v574_v7, %v363_v8 }
 0x188   :  { %728 = vmatmul.mubr.f32.vlgmr.msra.gmra.mxu1 %v368_v9 }
 0x248   :  { %v455_v14 = vpop.f32.mrf.mxu1 }
 0x249   :  { %v456_v15 = vadd.f32 %v575_v13, %v455_v14 }
 0x24a   :  { %v729_v16 = vpop.f32.mrf.mxu1 }
 0x24b   :  { %v459_v17 = vmax.f32 %v456_v15, 0.0 }
 0x24d   :  { %763 = vmatmul.mubr.f32.vlgmr.msra.gmra.mxu0 %v459_v17 }
 0x30d   :  { %v542_v20 = vpop.f32.mrf.mxu0 }
 0x30e   :  { %v551_v1 = vadd.f32 %v550_v19, %v542_v20 }
 0x30f   :  { %v764_v21 = vpop.f32.mrf.mxu0 }
 0x310   :  { %552 = vst [vmem:[#allocation11] sm:$0xff] %v551_v1 }
 0x311   :  { %888 = shalt.err (!%p885_p1)
}
 0x312   :  { %562 = dma.vmem_to_hbm [thread:$0]  %s560_s16, 128, %s1089_s8, [#allocation4]  }
 0x313   :  { %903 = dma.done.wait [#allocation4], 128  }
 0x314   :  { %904 = vsyncadd [#allocation4], 4294967168 }
 0x315   :  { %566 = vsyncpa [#allocation3], 1 }
 0x316   :  { %567 = vsyncpa [#allocation6], 1 }
 0x317   :  { %568 = vsyncpa [#allocation9], 1 }
 0x318   :  { %569 = vsyncpa [#allocation4], 1 }

</bundles_post_ra>
